<compile_context>
chip_gen: v7x
topology: tpu7x:2x2x1
jax: 0.10.0
libtpu: 0.0.40
codegen_flags: <defaults>
</compile_context>

<pallas_src>
import jax
import jax.numpy as jnp
from jax.experimental import pallas as pl
from jax.experimental.pallas import tpu as pltpu


def _linear_sigmoid_kernel(x_ref, w_ref, b_ref, o_ref):
    x = x_ref[...]            # (TILE_B, D) f32, batch on sublanes / D on lanes
    w = w_ref[...]            # (8, D) f32, eight identical rows of the weight
    b = b_ref[0, 0]           # scalar bias from SMEM

    # (8, D) . (TILE_B, D)^T -> (8, TILE_B): lane-dense result, batch on lanes.
    z = jax.lax.dot_general(
        w, x,
        dimension_numbers=(((1,), (1,)), ((), ())),
        precision=jax.lax.Precision.HIGHEST,
        preferred_element_type=jnp.float32,
    )
    # Sigmoid: exp goes to the EUP; exact f32 divide keeps the tight tolerance.
    o_ref[...] = 1.0 / (1.0 + jnp.exp(-(z + b)))


def _round_up(n: int, m: int) -> int:
    return ((n + m - 1) // m) * m


def simple_model_forward(x, weight, bias, *, max_tile_b=1024,
                         vmem_budget_bytes=8 * 1024 * 1024):
    """sigmoid(x @ weight.T + bias), matching torch.sigmoid(nn.Linear(D,1)(x)).

    x: [B, D] f32, weight: [1, D] f32 (PyTorch layout), bias: [1] f32.
    Returns [B, 1] f32.
    """
    B, D = x.shape
    itemsize = x.dtype.itemsize

    # Largest batch tile (multiple of 128 for lane-dense output blocks) whose
    # double-buffered x tile stays under a conservative scoped-VMEM budget.
    fit = max(128, (vmem_budget_bytes // (2 * D * itemsize)) // 128 * 128)
    if B <= 128:
        tile_b = _round_up(max(B, 1), 8)          # single full-extent tile
    else:
        tile_b = min(max_tile_b, fit, _round_up(B, 128))
    b_pad = _round_up(B, tile_b)
    grid = (b_pad // tile_b,)

    if b_pad != B:
        x = jnp.pad(x, ((0, b_pad - B), (0, 0)))

    # Row-replicate weight to 8 sublanes (tiny: 8*D floats) so every matmul /
    # store dimension is (8, 128)-tile friendly; lane layout of D is preserved.
    w8 = jnp.broadcast_to(weight.astype(jnp.float32), (8, D))
    b2d = bias.astype(jnp.float32).reshape(1, 1)

    out = pl.pallas_call(
        _linear_sigmoid_kernel,
        out_shape=jax.ShapeDtypeStruct((8, b_pad), jnp.float32),
        grid=grid,
        in_specs=[
            # x: tiled over batch, auto double-buffered by the BlockSpec pipeline.
            pl.BlockSpec((tile_b, D), lambda i: (i, 0)),
            # weight: same block every step -> stays resident in VMEM.
            pl.BlockSpec((8, D), lambda i: (0, 0)),
            # bias: SMEM scalar, essentially free.
            pl.BlockSpec((1, 1), lambda i: (0, 0),
                         memory_space=pltpu.MemorySpace.SMEM),
        ],
        # Lane-dense output slab: batch along lanes, 8 identical sublane rows.
        out_specs=pl.BlockSpec((8, tile_b), lambda i: (0, i)),
        compiler_params=pltpu.CompilerParams(
            dimension_semantics=("parallel",)),
    )(x, w8, b2d)

    # Row 0 holds the result; drop batch padding and restore the [B, 1] shape.
    return out[0, :B].reshape(B, 1)


if __name__ == "__main__":
    key = jax.random.PRNGKey(0)
    k_x, k_w, k_b = jax.random.split(key, 3)

    batch, input_dim = 256, 128

    bound = 1.0 / jnp.sqrt(input_dim)
    weight = jax.random.uniform(k_w, (1, input_dim), jnp.float32,
                                minval=-bound, maxval=bound)
    bias = jax.random.uniform(k_b, (1,), jnp.float32,
                              minval=-bound, maxval=bound)
    x = jax.random.normal(k_x, (batch, input_dim), dtype=jnp.float32)

    # TODO(synk): the registered buffer `cnt` is a host-side call counter with
    # no effect on the output; track it in plain Python.
    cnt = 0

    # max_tile_b=128 forces a 2-step grid at this small demo batch so the tiled
    # pipeline path is exercised; default tiles are larger for real batches.
    y = simple_model_forward(x, weight, bias, max_tile_b=128)
    cnt += 1
    jax.block_until_ready(y)

    # Reference: exact f32 elementwise reduction + sigmoid.
    y_ref = jax.nn.sigmoid(jnp.sum(x * weight, axis=-1, keepdims=True) + bias)
    assert y.shape == (batch, 1)
    assert jnp.allclose(y, y_ref, atol=1e-5), "mismatch vs reference"

    print("KERNEL_OK")
</pallas_src>

<mosaic_0001>
module attributes {stable_mosaic.version = 11 : i64} {
  func.func @_linear_sigmoid_kernel(%arg0: i32, %arg1: memref<128x128xf32, #tpu.memory_space<vmem>>, %arg2: memref<8x128xf32, #tpu.memory_space<vmem>>, %arg3: memref<1x1xf32, #tpu.memory_space<smem>>, %arg4: memref<8x128xf32, #tpu.memory_space<vmem>>) attributes {dimension_semantics = [#tpu.dimension_semantics<parallel>], iteration_bounds = array<i64: 2>, scalar_prefetch = 0 : i64, scratch_operands = 0 : i64, tpu.core_type = #tpu.core_type<tc>, window_params = [{transform_indices = @transform_0, window_bounds = array<i64: 128, 128>}, {pipeline_mode = #tpu.pipeline_mode<synchronous>, transform_indices = @transform_1, window_bounds = array<i64: 8, 128>}, {transform_indices = @transform_2, window_bounds = array<i64: 1, 1>}, {transform_indices = @transform_3, window_bounds = array<i64: 8, 128>}]} {
    %c0 = arith.constant 0 : index
    %c0_0 = arith.constant 0 : index
    %0 = vector.load %arg1[%c0, %c0_0] : memref<128x128xf32, #tpu.memory_space<vmem>>, vector<128x128xf32>
    %c0_1 = arith.constant 0 : index
    %c0_2 = arith.constant 0 : index
    %1 = vector.load %arg2[%c0_1, %c0_2] : memref<8x128xf32, #tpu.memory_space<vmem>>, vector<8x128xf32>
    %c0_3 = arith.constant 0 : index
    %c0_4 = arith.constant 0 : index
    %2 = memref.load %arg3[%c0_3, %c0_4] : memref<1x1xf32, #tpu.memory_space<smem>>
    %cst = arith.constant dense<0.000000e+00> : vector<8x128xf32>
    %3 = tpu.matmul %1, %0, %cst {dimension_numbers = #tpu.dot_dimension_numbers<[1], [1], [0], [0], [0, 0, 1, 0], [], []>, precision = #tpu.contract_precision<fp32>} : vector<8x128xf32>, vector<128x128xf32>, vector<8x128xf32> -> vector<8x128xf32>
    %4 = vector.broadcast %2 : f32 to vector<8x128xf32>
    %5 = arith.addf %3, %4 : vector<8x128xf32>
    %cst_5 = arith.constant 0.000000e+00 : f32
    %6 = vector.broadcast %cst_5 : f32 to vector<8x128xf32>
    %7 = arith.subf %6, %5 : vector<8x128xf32>
    %8 = math.exp %7 : vector<8x128xf32>
    %cst_6 = arith.constant 1.000000e+00 : f32
    %9 = vector.broadcast %cst_6 : f32 to vector<8x128xf32>
    %10 = arith.addf %9, %8 : vector<8x128xf32>
    %cst_7 = arith.constant 1.000000e+00 : f32
    %11 = vector.broadcast %cst_7 : f32 to vector<8x128xf32>
    %12 = arith.divf %11, %10 : vector<8x128xf32>
    %c0_8 = arith.constant 0 : index
    %c0_9 = arith.constant 0 : index
    %13 = vector.load %arg4[%c0_8, %c0_9] : memref<8x128xf32, #tpu.memory_space<vmem>>, vector<8x128xf32>
    tpu.vector_store %arg4[%c0_8, %c0_9], %12 {strides = array<i32>} : memref<8x128xf32, #tpu.memory_space<vmem>>, vector<8x128xf32>,
    return
  }
  func.func @transform_0(%arg0: i32) -> (i32, i32) {
    %c0_i32 = arith.constant 0 : i32
    %c0_i32_0 = arith.constant 0 : i32
    return %arg0, %c0_i32 : i32, i32
  }
  func.func @transform_1(%arg0: i32) -> (i32, i32) {
    %c0_i32 = arith.constant 0 : i32
    %c0_i32_0 = arith.constant 0 : i32
    %c0_i32_1 = arith.constant 0 : i32
    return %c0_i32, %c0_i32_0 : i32, i32
  }
  func.func @transform_2(%arg0: i32) -> (i32, i32) {
    %c0_i32 = arith.constant 0 : i32
    %c0_i32_0 = arith.constant 0 : i32
    %c0_i32_1 = arith.constant 0 : i32
    return %c0_i32, %c0_i32_0 : i32, i32
  }
  func.func @transform_3(%arg0: i32) -> (i32, i32) {
    %c0_i32 = arith.constant 0 : i32
    %c0_i32_0 = arith.constant 0 : i32
    return %c0_i32, %arg0 : i32, i32
  }
}

</mosaic_0001>

<bundles_post_ra>
// kernel: tpu_custom_call.1
= control target key start
LH: loop header
LB: loop body
LE: loop exit
PB: predicated region body
PF: predicated region fallthrough
CT: control target
= control target key end

     0   :  { %s2104_s0 = inlined_call_operand.hbm [shape: f32[256,128], index: 0, kind: input, shape index: {}]   ;;  %s2105_s1 = inlined_call_operand.hbm [shape: f32[8,128], index: 1, kind: input, shape index: {}]   ;;  %s2106_s2 = inlined_call_operand.<no memory space> [shape: f32[1,1], index: 2, kind: input, shape index: {}]   ;;  %s2107_s3 = inlined_call_operand.hbm [shape: f32[8,256], index: 3, kind: output, shape index: {}]  }
   0x1   :  { %8 = sst [smem:[#allocation2]] %s2106_s2 }
   0x2   :  { %9 = vsyncpa [#allocation4], 0 }
   0x3   :  { %11 = vsyncpa [#allocation4 + $0x1], 0 }
   0x4   :  { %12 = vsyncpa [#allocation7], 0 }
   0x5   :  { %13 = vsyncpa [#allocation5], 0 }
   0x6   :  { %15 = vsyncpa [#allocation5 + $0x1], 0  ;;  %s1674_s14 = smov 0   ;;  %s1676_s15 = smov 0  }
   0x7   :  { %s1678_s16 = smov 0   ;;  %s1680_s17 = smov 0  }
   0x8 LB: > { %s1695_s2 = sadd.s32 4294967295, %s1641_s17   ;;  %s965_s18 = sadd.s32 4294967294, %s1641_s17   ;;  %s1641_s17 = sphi %s1680_s17, %s2132_s17   ;;  %s1637_s16 = sphi %s1678_s16, %s2131_s16   ;;  %s1633_s15 = sphi %s1676_s15, %s2130_s15   ;;  %s1629_s14 = sphi %s1674_s14, %s2129_s14  }
   0x9   : > { %s1699_s19 = sadd.s32 1, %s1641_s17   ;;  %s28_s20 = sadd.s32 1, %s1637_s16 }
   0xa   : > { %s25_s21 = ssub.s32 %s1641_s17, %s1699_s19  ;;  %p35_p0 = scmp.ne.s32.totalorder %s1637_s16, %s1633_s15 }
   0xb   : > { %p26_p1 = scmp.eq.s32.totalorder %s25_s21, 0  ;;  %p36_p2 = scmp.eq.s32.totalorder %s1641_s17, 0 }
   0xc   : > { %p41_p3 = scmp.ne.s32.totalorder %s1633_s15, %s1629_s14  ;;  %p2108_p4 = scmp.eq.s32.totalorder %s1695_s2, 0 }
   0xd   : > { %s1711_s22 = scalar_select %p26_p1, %s1637_s16, %s28_s20  }
   0xe   : > { %p1713_p5 = por %p36_p2, %p35_p0  ;;  %p1719_p6 = por %p2108_p4, %p41_p3 }
   0xf   : > { %p107_p7 = scmp.eq.s32.totalorder %s1695_s2, 1  ;;  %p113_p8 = scmp.eq.s32.totalorder %s965_s18, 1 }
  0x10   : > { %s2114_s24 = scalar_select %p1719_p6, 1, 0 }
  0x11   : > { %p966_p9 = scmp.ge.s32.totalorder %s1641_s17, 1  ;;  %p120_p10 = scmp.lt.s32.totalorder %s1641_s17, 3 }
  0x12   : > { %p1726_p11 = por %p107_p7, %p35_p0  ;;  %p1730_p12 = por %p113_p8, %p41_p3 }
  0x13   : > { %p1734_p13 = pnand %p966_p9, %p120_p10  ;;  %s1643_s28 = smov [#allocation6]  }
  0x14   : > { %s2115_s25 = scalar_select %p1726_p11, 1, 0 }
  0x15   : > { %s2116_s26 = scalar_select %p1730_p12, 1, 0 }
  0x16   : > { %s2117_s27 = scalar_select %p1734_p13, 1, 0 }
  0x17   : > { %p1455_p2 = pneg %p1734_p13  ;;  %s133_s29 = sshll.u32 %s1643_s28, 4  ;;  %s134_s29 = int_to_ptr.vmem [resolvable:$true] %s133_s29 }
  0x18   : > { %p1468_p4 = scmp.lt.s32.totalorder %s1641_s17, 2  ;;  %p2118_p0 = scmp.eq.s32.totalorder %s1695_s2, 0 }
  0x19   : > { %s147_s4 = sand.u32 1, %s1637_s16   ;;  %s1513_s9 = scalar_lea.hbm %s2105_s1, 128 }
  0x1a   : > { %p1744_p7 = pnand %p1455_p2, %p2118_p0  ;;  %p1751_p3 = pnand %p1468_p4, %p1713_p5 }
  0x1b   : > { %s969_s6 = sshll.u32 %s147_s4, 7  ;;  %p1514_p8 = scmp.ne.s32.totalorder %s2105_s1, %s1513_s9 }
  0x1c   : > { %s2120_s5 = scalar_select %p1751_p3, 1, 0 }
  0x1d   : > { %p1515_p9 = pneg %p1744_p7  ;;  %p1520_p4 = scmp.lt.u32.totalorder %s1513_s9, %s2105_s1 }
  0x1f   : > { %p1516_p10 = pnand %p1515_p9, %p1514_p8 }
  0x21   : > { %p1517_p2 = pneg %p1516_p10 }
  0x23   : > { %p1522_p5 = pnand %p1520_p4, %p1517_p2 }
  0x25   : > { %1525 = shalt.err (!%p1522_p5)
}
  0x26   : > { %s1526_s18 = scalar_lea.vmem %s134_s29, 128  ;;  %p1534_p11 = scmp.lt.s32.totalorder %s134_s29, %s134_s29 }
  0x27   : > { %p1527_p0 = scmp.ne.s32.totalorder %s134_s29, %s1526_s18  ;;  %p1535_p6 = scmp.lt.s32.totalorder %s1526_s18, %s1526_s18 }
  0x29   : > { %p1529_p1 = pnand %p1527_p0, %p1515_p9  ;;  %p1536_p13 = por %p1535_p6, %p1534_p11 }
  0x2b   : > { %p1530_p12 = pneg %p1529_p1 }
  0x2d   : > { %p1537_p3 = pnand %p1536_p13, %p1530_p12 }
  0x2f   : > { %1540 = shalt.err (!%p1537_p3)
}
  0x30   : > { %1458 = dma.hbm_to_vmem [thread:$0]  (!%p1744_p7), %s2105_s1, 128, %s134_s29, [#allocation7]  }
  0x31   : > { %s980_s23 = sshll.u32 %s1641_s17, 11  ;;  %s151_s28 = scalar_lea.vmem [#allocation3], %s969_s6 }
  0x32   : > { %s158_s7 = sshll.u32 %s151_s28, 4  ;;  %s1775_s10 = scalar_lea.hbm %s2104_s0, %s980_s23  ;;  %s1777_s7 = int_to_ptr.vmem [resolvable:$true] %s158_s7 }
  0x33   : > { %s1779_s30 = scalar_lea.sflag [#allocation4], %s147_s4  ;;  %s1541_s11 = scalar_lea.hbm %s1775_s10, 2048 }
  0x34   : > { %p1542_p6 = scmp.ne.s32.totalorder %s1775_s10, %s1541_s11  ;;  %p2121_p11 = scmp.ne.s32.totalorder %s2120_s5, 0 }
  0x35   : > { %s1546_s12 = scalar_lea.hbm %s2104_s0, 4096  ;;  %p1547_p7 = scmp.lt.u32.totalorder %s1775_s10, %s2104_s0 }
  0x36   : > { %p1543_p12 = pneg %p2121_p11  ;;  %p1548_p3 = scmp.lt.u32.totalorder %s1546_s12, %s1541_s11 }
  0x37   : > { %p1550_p9 = scmp.lt.u32.totalorder %s1541_s11, %s1775_s10 }
  0x38   : > { %p1544_p13 = pnand %p1543_p12, %p1542_p6  ;;  %p1549_p8 = por %p1548_p3, %p1547_p7 }
  0x3a   : > { %p1545_p1 = pneg %p1544_p13  ;;  %p1551_p10 = por %p1550_p9, %p1549_p8 }
  0x3c   : > { %p1552_p2 = pnand %p1551_p10, %p1545_p1 }
  0x3e   : > { %1555 = shalt.err (!%p1552_p2)
}
  0x3f   : > { %s1556_s4 = scalar_lea.vmem %s1777_s7, 2048  ;;  %s1644_s20 = smov [#allocation3]  }
  0x40   : > { %p1557_p4 = scmp.ne.s32.totalorder %s1777_s7, %s1556_s4  ;;  %s1561_s21 = sshll.u32 %s1644_s20, 4  ;;  %s1562_s21 = int_to_ptr.vmem [resolvable:$false] %s1561_s21 }
  0x41   : > { %s1563_s23 = scalar_lea.vmem %s1562_s21, 4096  ;;  %p1564_p6 = scmp.lt.s32.totalorder %s1777_s7, %s1562_s21 }
  0x42   : > { %p1559_p5 = pnand %p1557_p4, %p1543_p12  ;;  %p1565_p13 = scmp.lt.s32.totalorder %s1563_s23, %s1556_s4 }
  0x44   : > { %p1560_p0 = pneg %p1559_p5  ;;  %p1566_p7 = por %p1565_p13, %p1564_p6 }
  0x46   : > { %p1567_p3 = pnand %p1566_p7, %p1560_p0 }
  0x48   : > { %1570 = shalt.err (!%p1567_p3)
}
  0x49   : > { %s1645_s28 = smov 128   ;;  %s1646_s8 = smov 8  }
  0x4a   : > { %1462 = dma.hbm_to_vmem [thread:$0]  (!%p2121_p11), %s1775_s10, 2048, %s1777_s7, %s1779_s30, %s1645_s28, %s1645_s28, %s1646_s8  }
  0x4b   : > { %p2122_p12 = scmp.ne.s32.totalorder %s2117_s27, 0 }
  0x4c   : > { %s1810_s9 = sand.u32 (!%p2122_p12), 1, %s1633_s15   ;;  %p2123_p1 = scmp.ne.s32.totalorder (!%p2122_p12), %s2114_s24, 0 }
  0x4d   : > { %170 = sbr.rel (%p2122_p12) target bundleno = 542 (0x21e), region = 32  ;;  %s973_s11 = sshll.u32 (!%p2122_p12), %s1810_s9, 7 }
  0x4e   : > { %s173_s29 = scalar_lea.sflag (!%p2122_p12), [#allocation4], %s1810_s9  ;;  %s1814_s6 = scalar_lea.vmem (!%p2122_p12), [#allocation3], %s973_s11 }
  0x54   : > { %1616 = dma.done.wait (%p2123_p1), %s173_s29, 2048  }
  0x55   : > { %1618 = vsyncadd (%p2123_p1), %s173_s29, 4294965248  ;;  %p2124_p11 = scmp.eq.s32.totalorder %s1695_s2, 0 }
  0x57   : > { %1620 = dma.done.wait (%p2124_p11), [#allocation7], 128   ;;  %p2125_p8 = pmov %p2124_p11 }
  0x58   : > { %v1647_v0 = vmov 0.0|0.0   ;;  %vm1648_vm0 = vmmov 0   ;;  %v1649_v1 = vmov 0.0   ;;  %v204_v2 = vld [vmem:[%s1814_s6] sm:$0xff]  ;;  %v205_v3 = vld [vmem:[%s1814_s6 + $0x8] sm:$0xff]  ;;  %v206_v6 = vld [vmem:[%s1814_s6 + $0x10] sm:$0xff] }
  0x59   : > { %1622 = vsyncadd (%p2125_p8), [#allocation7], 4294967168  ;;  %1293 = vmatprep.subr.bf16.mxu1 %v1647_v0  ;;  %1365 = vmatprep.subr.bf16.mxu0 %v1647_v0  ;;  %v224_v4 = vand.u32 4294901760, %v204_v2  ;;  %v227_v5 = vand.u32 4294901760, %v205_v3  ;;  %v207_v7 = vld [vmem:[%s1814_s6 + $0x18] sm:$0xff]  ;;  %v230_v9 = vand.u32 4294901760, %v206_v6 }
  0x5a   : > { %1115 = vmatprep.mubr.msk.f32.mxu1 %vm1648_vm0, %v1649_v1  ;;  %1220 = vmatprep.mubr.msk.f32.mxu0 %vm1648_vm0, %v1649_v1  ;;  %v233_v10 = vand.u32 4294901760, %v207_v7  ;;  %v208_v12 = vld [vmem:[%s1814_s6 + $0x20] sm:$0xff]  ;;  %v209_v13 = vld [vmem:[%s1814_s6 + $0x28] sm:$0xff]  ;;  %v210_v17 = vld [vmem:[%s1814_s6 + $0x30] sm:$0xff]  ;;  %s221_s24 = sld [smem:[#allocation2]]  ;;  %s975_s27 = sshll.u32 %s1810_s9, 3 }
  0x5b   : > { %v1834_v8 = vpack.c.bf16 %v227_v5, %v224_v4  ;;  %v236_v14 = vand.u32 4294901760, %v208_v12  ;;  %v239_v15 = vand.u32 4294901760, %v209_v13  ;;  %v211_v18 = vld [vmem:[%s1814_s6 + $0x38] sm:$0xff]  ;;  %v242_v19 = vand.u32 4294901760, %v210_v17  ;;  %v212_v23 = vld [vmem:[%s1814_s6 + $0x40] sm:$0xff]  ;;  %v213_v24 = vld [vmem:[%s1814_s6 + $0x48] sm:$0xff] }
  0x5c   : > { %v1840_v11 = vpack.c.bf16 %v233_v10, %v230_v9  ;;  %v245_v20 = vand.u32 4294901760, %v211_v18  ;;  %v1856_v21 = vsub.f32 %v204_v2, %v224_v4  ;;  %v1858_v22 = vsub.f32 %v205_v3, %v227_v5  ;;  %v214_v41 = vld [vmem:[%s1814_s6 + $0x50] sm:$0xff]  ;;  %v215_v42 = vld [vmem:[%s1814_s6 + $0x58] sm:$0xff]  ;;  %v216_v49 = vld [vmem:[%s1814_s6 + $0x60] sm:$0xff]  ;;  %s977_s5 = sshll.u32 %s1695_s2, 7  ;;  %s202_s7 = scalar_lea.vmem [#allocation8], %s975_s27 }
  0x5d   : > { %1295 = vmatpush3.bf16.xpose.msra.mxu1 %v1834_v8  ;;  %1367 = vmatpush3.bf16.xpose.msra.mxu0 %v1834_v8  ;;  %v1848_v16 = vpack.c.bf16 %v239_v15, %v236_v14  ;;  %v1862_v25 = vsub.f32 %v206_v6, %v230_v9  ;;  %v1864_v26 = vsub.f32 %v207_v7, %v233_v10  ;;  %v248_v33 = vand.u32 4294901760, %v212_v23  ;;  %v217_v50 = vld [vmem:[%s1814_s6 + $0x68] sm:$0xff]  ;;  %v220_v56 = vld [vmem:[#allocation6] sm:$0xff]  ;;  %v218_v58 = vld [vmem:[%s1814_s6 + $0x70] sm:$0xff]  ;;  %s885_s10 = sshll.u32 %s202_s7, 4  ;;  %s2060_s13 = scalar_lea.hbm %s2107_s3, %s977_s5  ;;  %s2062_s10 = int_to_ptr.vmem [resolvable:$true] %s885_s10 }
  0x5e   : > { %1296 = vmatprep.subr.bf16.mxu1 %v1647_v0  ;;  %1368 = vmatprep.subr.bf16.mxu0 %v1647_v0  ;;  %v1866_v27 = vsub.f32 %v208_v12, %v236_v14  ;;  %v1868_v28 = vsub.f32 %v209_v13, %v239_v15  ;;  %v1870_v29 = vpack.c.bf16 %v245_v20, %v242_v19  ;;  %v251_v34 = vand.u32 4294901760, %v213_v24  ;;  %v219_v59 = vld [vmem:[%s1814_s6 + $0x78] sm:$0xff]  ;;  %s872_s18 = scalar_lea.sflag [#allocation5], %s1810_s9  ;;  %s1571_s4 = scalar_lea.vmem %s2062_s10, 128 }
  0x5f   : > { %v1342_v30 = vpack.c.bf16 %v1858_v22, %v1856_v21  ;;  %v1874_v31 = vsub.f32 %v210_v17, %v242_v19  ;;  %v1876_v32 = vsub.f32 %v211_v18, %v245_v20  ;;  %v1345_v35 = vpack.c.bf16 %v1864_v26, %v1862_v25  ;;  %p1572_p9 = scmp.ne.s32.totalorder %s2062_s10, %s1571_s4  ;;  %p2126_p10 = scmp.ne.s32.totalorder %s2115_s25, 0 }
  0x60   : > { %v1880_v36 = vsub.f32 %v212_v23, %v248_v33  ;;  %v1882_v37 = vsub.f32 %v213_v24, %v251_v34  ;;  %v1348_v38 = vpack.c.bf16 %v1868_v28, %v1866_v27  ;;  %v1896_v43 = vpack.c.bf16 %v251_v34, %v248_v33  ;;  %s1650_s2 = smov [#allocation8]  }
  0x61   : > { %v1351_v39 = vpack.c.bf16 %v1876_v32, %v1874_v31  ;;  %v254_v44 = vand.u32 4294901760, %v214_v41  ;;  %v257_v45 = vand.u32 4294901760, %v215_v42  ;;  %v260_v52 = vand.u32 4294901760, %v216_v49  ;;  %p1573_p2 = pnand %p1572_p9, %p2126_p10  ;;  %s1575_s20 = sshll.u32 %s1650_s2, 4  ;;  %s1576_s20 = int_to_ptr.vmem [resolvable:$false] %s1575_s20 }
  0x62   : > { %v1354_v40 = vpack.c.bf16 %v1882_v37, %v1880_v36  ;;  %v263_v53 = vand.u32 4294901760, %v217_v50  ;;  %v1924_v60 = vand.u32 4294901760, %v220_v56  ;;  %v266_v62 = vand.u32 4294901760, %v218_v58  ;;  %s1577_s21 = scalar_lea.vmem %s1576_s20, 256  ;;  %p1578_p5 = scmp.lt.s32.totalorder %s2062_s10, %s1576_s20 }
  0x63   : > { %v1898_v46 = vsub.f32 %v214_v41, %v254_v44  ;;  %v1900_v47 = vsub.f32 %v215_v42, %v257_v45  ;;  %v1910_v51 = vpack.c.bf16 %v257_v45, %v254_v44  ;;  %v1912_v54 = vsub.f32 %v216_v49, %v260_v52  ;;  %p1574_p4 = pneg %p1573_p2  ;;  %p1579_p0 = scmp.lt.s32.totalorder %s1577_s21, %s1571_s4 }
  0x64   : > { %v1914_v55 = vsub.f32 %v217_v50, %v263_v53  ;;  %v1926_v61 = vpack.c.bf16 %v263_v53, %v260_v52  ;;  %v269_v63 = vand.u32 4294901760, %v219_v59  ;;  %v1928_v2 = vsub.f32 %v218_v58, %v266_v62 }
  0x65   : > { %1298 = vmatpush3.bf16.xpose.msra.mxu1 %v1840_v11  ;;  %1370 = vmatpush3.bf16.xpose.msra.mxu0 %v1840_v11  ;;  %v1357_v48 = vpack.c.bf16 %v1900_v47, %v1898_v46  ;;  %v1933_v4 = vsub.f32 %v220_v56, %v1924_v60  ;;  %v317_v5 = vand.u32 4294901760, %v1856_v21  ;;  %v324_v6 = vand.u32 4294901760, %v1858_v22  ;;  %p1580_p6 = por %p1579_p0, %p1578_p5 }
  0x66   : > { %1299 = vmatprep.subr.bf16.mxu1 %v1647_v0  ;;  %1371 = vmatprep.subr.bf16.mxu0 %v1647_v0  ;;  %v1360_v57 = vpack.c.bf16 %v1914_v55, %v1912_v54  ;;  %v1930_v3 = vsub.f32 %v219_v59, %v269_v63  ;;  %v1944_v10 = vpack.c.bf16 %v269_v63, %v266_v62  ;;  %v331_v18 = vand.u32 4294901760, %v1862_v25 }
  0x67   : > { %v306_v9 = vand.u32 4294901760, %v1933_v4  ;;  %v318_v12 = vsub.f32 %v1856_v21, %v317_v5  ;;  %v325_v13 = vsub.f32 %v1858_v22, %v324_v6  ;;  %v338_v19 = vand.u32 4294901760, %v1864_v26  ;;  %p1581_p13 = pnand %p1580_p6, %p1574_p4 }
  0x68   : > { %v1363_v7 = vpack.c.bf16 %v1930_v3, %v1928_v2  ;;  %v1390_v24 = vpack.c.bf16 %v324_v6, %v317_v5  ;;  %v332_v33 = vsub.f32 %v1862_v25, %v331_v18  ;;  %v345_v44 = vand.u32 4294901760, %v1866_v27 }
  0x69   : > { %v307_v14 = vsub.f32 %v1933_v4, %v306_v9  ;;  %v319_v15 = vand.u32 4294901760, %v318_v12  ;;  %v326_v17 = vand.u32 4294901760, %v325_v13  ;;  %v339_v34 = vsub.f32 %v1864_v26, %v338_v19 }
  0x6a   : > { %v333_v41 = vand.u32 4294901760, %v332_v33  ;;  %v352_v45 = vand.u32 4294901760, %v1868_v28  ;;  %v1393_v50 = vpack.c.bf16 %v338_v19, %v331_v18  ;;  %v346_v52 = vsub.f32 %v1866_v27, %v345_v44 }
  0x6b   : > { %v308_v20 = vand.u32 4294901760, %v307_v14  ;;  %v1318_v23 = vpack.c.bf16 %v326_v17, %v319_v15  ;;  %v340_v42 = vand.u32 4294901760, %v339_v34  ;;  %v359_v59 = vand.u32 4294901760, %v1874_v31 }
  0x6c   : > { %v353_v53 = vsub.f32 %v1868_v28, %v352_v45  ;;  %v347_v56 = vand.u32 4294901760, %v346_v52  ;;  %v366_v62 = vand.u32 4294901760, %v1876_v32  ;;  %v1396_v5 = vpack.c.bf16 %v352_v45, %v345_v44 }
  0x6d   : > { %1301 = vmatpush3.bf16.xpose.msra.mxu1 %v1848_v16  ;;  %1373 = vmatpush3.bf16.xpose.msra.mxu0 %v1848_v16  ;;  %v1321_v49 = vpack.c.bf16 %v340_v42, %v333_v41  ;;  %v360_v6 = vsub.f32 %v1874_v31, %v359_v59  ;;  %v373_v14 = vand.u32 4294901760, %v1880_v36  ;;  %v380_v15 = vand.u32 4294901760, %v1882_v37 }
  0x6e   : > { %1302 = vmatprep.subr.bf16.mxu1 %v1647_v0  ;;  %1374 = vmatprep.subr.bf16.mxu0 %v1647_v0  ;;  %v354_v58 = vand.u32 4294901760, %v353_v53  ;;  %v1399_v18 = vpack.c.bf16 %v366_v62, %v359_v59  ;;  %v387_v33 = vand.u32 4294901760, %v1898_v46  ;;  %v394_v34 = vand.u32 4294901760, %v1900_v47 }
  0x6f   : > { %v361_v12 = vand.u32 4294901760, %v360_v6  ;;  %v374_v19 = vsub.f32 %v1880_v36, %v373_v14  ;;  %v1402_v42 = vpack.c.bf16 %v380_v15, %v373_v14  ;;  %v401_v52 = vand.u32 4294901760, %v1912_v54 }
  0x70   : > { %v1324_v63 = vpack.c.bf16 %v354_v58, %v347_v56  ;;  %v388_v44 = vsub.f32 %v1898_v46, %v387_v33  ;;  %v395_v45 = vsub.f32 %v1900_v47, %v394_v34  ;;  %v408_v53 = vand.u32 4294901760, %v1914_v55 }
  0x71   : > { %v1405_v58 = vpack.c.bf16 %v394_v34, %v387_v33  ;;  %v402_v59 = vsub.f32 %v1912_v54, %v401_v52  ;;  %v415_v6 = vand.u32 4294901760, %v1928_v2 }
  0x73   : > { %v416_v14 = vsub.f32 %v1928_v2, %v415_v6 }
  0x75   : > { %1304 = vmatpush3.bf16.xpose.msra.mxu1 %v1870_v29  ;;  %1376 = vmatpush3.bf16.xpose.msra.mxu0 %v1870_v29 }
  0x76   : > { %1305 = vmatprep.subr.bf16.mxu1 %v1647_v0  ;;  %1377 = vmatprep.subr.bf16.mxu0 %v1647_v0 }
  0x7d   : > { %1307 = vmatpush3.bf16.xpose.msra.mxu1 %v1896_v43  ;;  %1379 = vmatpush3.bf16.xpose.msra.mxu0 %v1896_v43 }
  0x7e   : > { %1308 = vmatprep.subr.bf16.mxu1 %v1647_v0  ;;  %1380 = vmatprep.subr.bf16.mxu0 %v1647_v0 }
  0x85   : > { %1310 = vmatpush3.bf16.xpose.msra.mxu1 %v1910_v51  ;;  %1382 = vmatpush3.bf16.xpose.msra.mxu0 %v1910_v51 }
  0x86   : > { %1311 = vmatprep.subr.bf16.mxu1 %v1647_v0  ;;  %1383 = vmatprep.subr.bf16.mxu0 %v1647_v0 }
  0x8d   : > { %1313 = vmatpush3.bf16.xpose.msra.mxu1 %v1926_v61  ;;  %1385 = vmatpush3.bf16.xpose.msra.mxu0 %v1926_v61 }
  0x8e   : > { %1314 = vmatprep.subr.bf16.mxu1 %v1647_v0  ;;  %1386 = vmatprep.subr.bf16.mxu0 %v1647_v0 }
  0x95   : > { %1316 = vmatpush3.bf16.xpose.msra.mxu1 %v1944_v10  ;;  %1388 = vmatpush3.bf16.xpose.msra.mxu0 %v1944_v10 }
  0x96   : > { %1317 = vmatprep.subr.bf16.mxu1 %v1647_v0  ;;  %1389 = vmatprep.subr.bf16.mxu0 %v1647_v0 }
  0x9c   : > { %1116 = vmatmul.mubr.f32.vlgmr.msra.gmra.mrb[0].mxu1 %v308_v20  ;;  %1221 = vmatmul.mubr.f32.vlgmr.msra.gmra.mrb[0].mxu0 %v306_v9  ;;  %v367_v9 = vsub.f32 %v1876_v32, %v366_v62  ;;  %v381_v20 = vsub.f32 %v1882_v37, %v380_v15  ;;  %v409_v62 = vsub.f32 %v1914_v55, %v408_v53 }
  0x9d   : > { %1319 = vmatpush3.bf16.xpose.msra.mxu1 %v1318_v23  ;;  %1391 = vmatpush3.bf16.xpose.msra.mxu0 %v1390_v24  ;;  %v375_v23 = vand.u32 4294901760, %v374_v19 }
  0x9e   : > { %1320 = vmatprep.subr.bf16.mxu1 %v1647_v0  ;;  %1392 = vmatprep.subr.bf16.mxu0 %v1647_v0  ;;  %v368_v13 = vand.u32 4294901760, %v367_v9  ;;  %v382_v24 = vand.u32 4294901760, %v381_v20  ;;  %v422_v9 = vand.u32 4294901760, %v1930_v3 }
  0x9f   : > { %1150 = vmatprep.mubr.msk.f32.mxu1 %vm1648_vm0, %v1649_v1  ;;  %1255 = vmatprep.mubr.msk.f32.mxu0 %vm1648_vm0, %v1649_v1 }
  0xa0   : > { %v1327_v17 = vpack.c.bf16 %v368_v13, %v361_v12  ;;  %v1330_v41 = vpack.c.bf16 %v382_v24, %v375_v23  ;;  %v1408_v13 = vpack.c.bf16 %v408_v53, %v401_v52  ;;  %v423_v15 = vsub.f32 %v1930_v3, %v422_v9 }
  0xa1   : > { %v1411_v20 = vpack.c.bf16 %v422_v9, %v415_v6 }
  0xa5   : > { %1322 = vmatpush3.bf16.xpose.msra.mxu1 %v1321_v49  ;;  %1394 = vmatpush3.bf16.xpose.msra.mxu0 %v1393_v50  ;;  %v389_v49 = vand.u32 4294901760, %v388_v44  ;;  %v396_v50 = vand.u32 4294901760, %v395_v45 }
  0xa6   : > { %1323 = vmatprep.subr.bf16.mxu1 %v1647_v0  ;;  %1395 = vmatprep.subr.bf16.mxu0 %v1647_v0 }
  0xa7   : > { %v1333_v56 = vpack.c.bf16 %v396_v50, %v389_v49 }
  0xad   : > { %1325 = vmatpush3.bf16.xpose.msra.mxu1 %v1324_v63  ;;  %1397 = vmatpush3.bf16.xpose.msra.mxu0 %v1396_v5  ;;  %v403_v63 = vand.u32 4294901760, %v402_v59  ;;  %v410_v5 = vand.u32 4294901760, %v409_v62 }
  0xae   : > { %1326 = vmatprep.subr.bf16.mxu1 %v1647_v0  ;;  %1398 = vmatprep.subr.bf16.mxu0 %v1647_v0 }
  0xaf   : > { %v1336_v12 = vpack.c.bf16 %v410_v5, %v403_v63 }
  0xb5   : > { %1328 = vmatpush3.bf16.xpose.msra.mxu1 %v1327_v17  ;;  %1400 = vmatpush3.bf16.xpose.msra.mxu0 %v1399_v18  ;;  %v417_v17 = vand.u32 4294901760, %v416_v14  ;;  %v424_v18 = vand.u32 4294901760, %v423_v15 }
  0xb6   : > { %1329 = vmatprep.subr.bf16.mxu1 %v1647_v0  ;;  %1401 = vmatprep.subr.bf16.mxu0 %v1647_v0 }
  0xb7   : > { %v1339_v19 = vpack.c.bf16 %v424_v18, %v417_v17 }
  0xbd   : > { %1331 = vmatpush3.bf16.xpose.msra.mxu1 %v1330_v41  ;;  %1403 = vmatpush3.bf16.xpose.msra.mxu0 %v1402_v42 }
  0xbe   : > { %1332 = vmatprep.subr.bf16.mxu1 %v1647_v0  ;;  %1404 = vmatprep.subr.bf16.mxu0 %v1647_v0 }
  0xc5   : > { %1334 = vmatpush3.bf16.xpose.msra.mxu1 %v1333_v56  ;;  %1406 = vmatpush3.bf16.xpose.msra.mxu0 %v1405_v58 }
  0xc6   : > { %1335 = vmatprep.subr.bf16.mxu1 %v1647_v0  ;;  %1407 = vmatprep.subr.bf16.mxu0 %v1647_v0 }
  0xcd   : > { %1337 = vmatpush3.bf16.xpose.msra.mxu1 %v1336_v12  ;;  %1409 = vmatpush3.bf16.xpose.msra.mxu0 %v1408_v13 }
  0xce   : > { %1338 = vmatprep.subr.bf16.mxu1 %v1647_v0  ;;  %1410 = vmatprep.subr.bf16.mxu0 %v1647_v0 }
  0xd5   : > { %1340 = vmatpush3.bf16.xpose.msra.mxu1 %v1339_v19  ;;  %1412 = vmatpush3.bf16.xpose.msra.mxu0 %v1411_v20 }
  0xd6   : > { %1341 = vmatprep.subr.bf16.mxu1 %v1647_v0  ;;  %1413 = vmatprep.subr.bf16.mxu0 %v1647_v0 }
  0xdc   : > { %1151 = vmatmul.mubr.f32.vlgmr.msra.gmra.mrb[0].mxu1 %v1924_v60  ;;  %1256 = vmatmul.mubr.f32.vlgmr.msra.gmra.mrb[0].mxu0 %v1924_v60 }
  0xdd   : > { %1343 = vmatpush3.bf16.xpose.msra.mxu1 %v1342_v30  ;;  %1415 = vmatpush3.bf16.xpose.msra.mxu0 %v1834_v8 }
  0xde   : > { %1344 = vmatprep.subr.bf16.mxu1 %v1647_v0  ;;  %1416 = vmatprep.subr.bf16.mxu0 %v1647_v0 }
  0xdf   : > { %1185 = vmatprep.mubr.msk.f32.mxu1 %vm1648_vm0, %v1649_v1  ;;  %1290 = vmatprep.mubr.msk.f32.mxu0 %vm1648_vm0, %v1649_v1  ;;  %v222_v1 = vstv %s221_s24 }
  0xe5   : > { %1346 = vmatpush3.bf16.xpose.msra.mxu1 %v1345_v35  ;;  %1418 = vmatpush3.bf16.xpose.msra.mxu0 %v1840_v11 }
  0xe6   : > { %1347 = vmatprep.subr.bf16.mxu1 %v1647_v0  ;;  %1419 = vmatprep.subr.bf16.mxu0 %v1647_v0 }
  0xed   : > { %1349 = vmatpush3.bf16.xpose.msra.mxu1 %v1348_v38  ;;  %1421 = vmatpush3.bf16.xpose.msra.mxu0 %v1848_v16 }
  0xee   : > { %1350 = vmatprep.subr.bf16.mxu1 %v1647_v0  ;;  %1422 = vmatprep.subr.bf16.mxu0 %v1647_v0 }
  0xf5   : > { %1352 = vmatpush3.bf16.xpose.msra.mxu1 %v1351_v39  ;;  %1424 = vmatpush3.bf16.xpose.msra.mxu0 %v1870_v29 }
  0xf6   : > { %1353 = vmatprep.subr.bf16.mxu1 %v1647_v0  ;;  %1425 = vmatprep.subr.bf16.mxu0 %v1647_v0 }
  0xfd   : > { %1355 = vmatpush3.bf16.xpose.msra.mxu1 %v1354_v40  ;;  %1427 = vmatpush3.bf16.xpose.msra.mxu0 %v1896_v43 }
  0xfe   : > { %1356 = vmatprep.subr.bf16.mxu1 %v1647_v0  ;;  %1428 = vmatprep.subr.bf16.mxu0 %v1647_v0 }
 0x105   : > { %1358 = vmatpush3.bf16.xpose.msra.mxu1 %v1357_v48  ;;  %1430 = vmatpush3.bf16.xpose.msra.mxu0 %v1910_v51 }
 0x106   : > { %1359 = vmatprep.subr.bf16.mxu1 %v1647_v0  ;;  %1431 = vmatprep.subr.bf16.mxu0 %v1647_v0 }
 0x10d   : > { %1361 = vmatpush3.bf16.xpose.msra.mxu1 %v1360_v57  ;;  %1433 = vmatpush3.bf16.xpose.msra.mxu0 %v1926_v61 }
 0x10e   : > { %1362 = vmatprep.subr.bf16.mxu1 %v1647_v0  ;;  %1434 = vmatprep.subr.bf16.mxu0 %v1647_v0 }
 0x115   : > { %1364 = vmatpush3.bf16.xpose.msra.mxu1 %v1363_v7  ;;  %1436 = vmatpush3.bf16.xpose.msra.mxu0 %v1944_v10 }
 0x11c   : > { %1186 = vmatmul.mubr.f32.vlgmr.msra.gmra.mrb[0].mxu1 %v1933_v4  ;;  %1291 = vmatmul.mubr.f32.vlgmr.msra.gmra.mrb[0].mxu0 %v1924_v60 }
 0x1ef   : > { %v565_v8 = vpop.f32.mrb[0].mxu1  ;;  %v860_v11 = vpop.f32.mrb[0].mxu0 }
 0x1f0   : > { %v1437_v16 = vadd.f32 %v565_v8, %v222_v1  ;;  %v1187_v21 = vpop.f32.mrb[1].mxu1  ;;  %v1292_v22 = vpop.f32.mrb[1].mxu0 }
 0x1f2   : > { %v1438_v0 = vadd.f32 %v1437_v16, %v860_v11 }
 0x1f4   : > { %v864_v25 = vsub.f32 0.0, %v1438_v0 }
 0x1f6   : > { %v865_v26 = vmul.f32 1.442695, %v864_v25 }
 0x1f8   : > { %1509 = vpow2.f32 %v865_v26 }
 0x202   : > { %v1510_v27 = vpop.eup %1509 }
 0x203   : > { %v867_v28 = vadd.f32 1.0, %v1510_v27 }
 0x205   : > { %1511 = vrcp.f32 %v867_v28 }
 0x20f   : > { %v1512_v29 = vpop.eup %1511 }
 0x210   : > { %870 = vst [vmem:[%s202_s7] sm:$0xff] %v1512_v29 }
 0x211   : > { %1584 = shalt.err (!%p1581_p13)
}
 0x212   : > { %s1585_s23 = scalar_lea.hbm %s2060_s13, 128  ;;  %s1589_s9 = scalar_lea.hbm %s2107_s3, 256 }
 0x213   : > { %p1586_p7 = scmp.ne.s32.totalorder %s2060_s13, %s1585_s23  ;;  %p1590_p1 = scmp.lt.u32.totalorder %s2060_s13, %s2107_s3 }
 0x214   : > { %p1591_p11 = scmp.lt.u32.totalorder %s1589_s9, %s1585_s23  ;;  %p1593_p9 = scmp.lt.u32.totalorder %s1585_s23, %s2060_s13 }
 0x215   : > { %p1587_p3 = pnand %p1586_p7, %p2126_p10 }
 0x216   : > { %p1592_p8 = por %p1591_p11, %p1590_p1 }
 0x217   : > { %p1588_p12 = pneg %p1587_p3 }
 0x218   : > { %p1594_p2 = por %p1593_p9, %p1592_p8 }
 0x21a   : > { %p1595_p4 = pnand %p1594_p2, %p1588_p12 }
 0x21c   : > { %1598 = shalt.err (!%p1595_p4)
}
 0x21d   : > { %1453 = dma.vmem_to_hbm [thread:$0]  (%p2126_p10), %s2062_s10, 128, %s2060_s13, %s872_s18  }
 0x21e PF: > { %s897_s6 = sand.u32 1, %s1629_s14   ;;  %p2127_p5 = scmp.ne.s32.totalorder %s2116_s26, 0 }
 0x21f   : > { %p2128_p0 = scmp.ge.s32.totalorder %s1641_s17, 2  ;;  %s898_s24 = scalar_lea.sflag [#allocation5], %s897_s6 }
 0x221   : > { %p1464_p6 = pnand %p2128_p0, %p2127_p5 }
 0x223   : > { %1624 = dma.done.wait (!%p1464_p6), %s898_s24, 128  }
 0x224   : > { %1626 = vsyncadd (!%p1464_p6), %s898_s24, 4294967168  ;;  %p18_p13 = scmp.ge.s32.totalorder %s1699_s19, 4   ;;  %s2129_s14 = smov %s1633_s15 }
 0x225   : > { %s2130_s15 = smov %s1637_s16  ;;  %s2131_s16 = smov %s1711_s22 }
 0x226   : > { %s2132_s17 = smov %s1699_s19  ;;  %20 = sbr.rel (!%p18_p13) target bundleno = 8 (0x8), region = 81 }
 0x22d   :  { %903 = vsyncpa [#allocation4], 1 }
 0x22e   :  { %905 = vsyncpa [#allocation4 + $0x1], 1 }
 0x22f   :  { %906 = vsyncpa [#allocation7], 1 }
 0x230   :  { %907 = vsyncpa [#allocation5], 1 }
 0x231   :  { %909 = vsyncpa [#allocation5 + $0x1], 1 }

</bundles_post_ra>
